<compile_context>
chip_gen: v5e
topology: v5e:2x2
jax: 0.10.0
libtpu: 0.0.40
codegen_flags: <defaults>
</compile_context>

<pallas_src>
import functools
import math

import jax
import jax.numpy as jnp
import numpy as np
from jax.experimental import pallas as pl
from jax.experimental.pallas import tpu as pltpu

_LANES = 128
_SUBLANES = 8
_MAX_TILE_BYTES = 4 * 1024 * 1024   # per output block (x2 while double-buffered)
_MAX_GROUPS_PER_TILE = 64           # bounds the unrolled kernel body
_RESEED_PERIOD = 16                 # exact sin/cos seed every N groups
_MIN_SPLIT_ROWS = 64                # don't split into tiles smaller than this
_MAX_FLAT_L = 32                    # flat path only if the lane period is small


def _round_up(x, m):
    return ((x + m - 1) // m) * m


def _flat_group_rows(d_model):
    """Row period of the (feature, position-offset) lane pattern in the flat
    (rows, 128) layout, rounded up to whole 8-row sublanes (lcm(p, 8))."""
    p = d_model // math.gcd(d_model, _LANES)
    return p * _SUBLANES // math.gcd(p, _SUBLANES)


def _make_consts(d_model, L, cols, flat):
    """Per-(row-in-group, lane) constants, shape (5, L, cols) float32:
         [0] freq   : pair frequency exp(-ln(1e4)/d * 2*floor(k/2))
         [1] p0     : position of this element within group 0
         [2] odd    : 1.0 where the feature index k is odd (cos lane)
         [3] cos(A) : A = (positions per group) * freq, rotation step
         [4] sin(A)
       Returns (consts, positions_per_group)."""
    if flat:
        f = np.arange(L * cols).reshape(L, cols)
        k = f % d_model
        p0 = (f // d_model).astype(np.float64)
        q = (L * cols) // d_model
    else:
        k = np.broadcast_to(np.arange(cols), (L, cols))
        p0 = np.broadcast_to(np.arange(L, dtype=np.float64)[:, None], (L, cols))
        q = L
    pair = (k - (k % 2)).astype(np.float64)
    freq = np.exp(pair * (-(math.log(10000.0) / d_model)))
    odd = (k % 2).astype(np.float64)
    # Rotation step for advancing by one group (q positions): computed in f64
    # from the f32 frequency the kernel actually uses, so cos/sin are correctly
    # rounded and the recurrence only accumulates ~1 ulp per step.
    step = q * freq.astype(np.float32).astype(np.float64)
    consts = np.stack(
        [freq, p0, odd, np.cos(step), np.sin(step)], axis=0).astype(np.float32)
    return jnp.asarray(consts), float(q)


def _pe_kernel(const_ref, o_ref, *, groups_per_tile, rows_per_group,
               pos_per_group, reseed_period):
    """Writes (groups_per_tile * rows_per_group, cols) rows of the table.
    Each L-row group is either seeded exactly (one sin + one cos per element)
    or advanced from the previous group with the angle-addition recurrence
    (4 mul + 2 add per element, no transcendental)."""
    L = rows_per_group
    freq = const_ref[0]
    p0 = const_ref[1]
    odd = const_ref[2] > 0.5
    c_step = const_ref[3]
    s_step = const_ref[4]
    g0 = pl.program_id(0) * groups_per_tile      # absolute first group index

    s = None
    c = None
    for j in range(groups_per_tile):
        carry_needed = (j + 1 < groups_per_tile) and ((j + 1) % reseed_period != 0)
        if j % reseed_period == 0:
            # Exact seed: pos is an exact f32 integer, so `arg` matches the
            # reference's `position * div_term` rounding.
            pos = (g0 + j).astype(jnp.float32) * pos_per_group + p0
            arg = pos * freq
            sn = jnp.sin(arg)
            cs = jnp.cos(arg)
            s = jnp.where(odd, cs, sn)           # value: sin even / cos odd
            c = jnp.where(odd, -sn, cs)          # quadrature carry
        else:
            s_new = s * c_step + c * s_step      # sin(theta + A)
            if carry_needed:
                c = c * c_step - s * s_step      # cos(theta + A)
            s = s_new
        o_ref[j * L:(j + 1) * L, :] = s


@functools.lru_cache(maxsize=64)
def _pe_table(seq_len, d_model):
    """pe[:seq_len] of shape (1, seq_len, d_model), float32 (built once per
    (seq_len, d_model), mirroring the PyTorch register_buffer)."""
    seq_len = int(seq_len)
    d_model = int(d_model)

    flat = False
    L = _SUBLANES
    if d_model < _LANES:
        L_flat = _flat_group_rows(d_model)
        if L_flat <= _MAX_FLAT_L:
            flat, L = True, L_flat
    if flat:
        cols = _LANES
        rows_needed = pl.cdiv(seq_len * d_model, _LANES)
    else:
        cols = d_model
        rows_needed = seq_len

    consts, pos_per_group = _make_consts(d_model, L, cols, flat)

    # ---- tile / grid selection: pick the tile count first, then the size ----
    rows_by_vmem = max(L, (_MAX_TILE_BYTES // (cols * 4)) // L * L)
    rows_cap = min(rows_by_vmem, _MAX_GROUPS_PER_TILE * L)
    n_tiles = pl.cdiv(rows_needed, rows_cap)
    # v7x has 2 TensorCores; keep >= 2 (>= 4) parallel blocks when there is
    # enough work per block.
    if rows_needed >= 2 * _MIN_SPLIT_ROWS:
        n_tiles = max(n_tiles, 2)
    if rows_needed >= 4 * _MIN_SPLIT_ROWS:
        n_tiles = max(n_tiles, 4)
    tile_rows = _round_up(pl.cdiv(rows_needed, n_tiles), L)
    n_tiles = pl.cdiv(rows_needed, tile_rows)
    rows_padded = n_tiles * tile_rows
    groups_per_tile = tile_rows // L

    kernel = functools.partial(
        _pe_kernel,
        groups_per_tile=groups_per_tile,
        rows_per_group=L,
        pos_per_group=pos_per_group,
        reseed_period=_RESEED_PERIOD,
    )
    table = pl.pallas_call(
        kernel,
        out_shape=jax.ShapeDtypeStruct((rows_padded, cols), jnp.float32),
        grid_spec=pltpu.PrefetchScalarGridSpec(
            num_scalar_prefetch=0,
            grid=(n_tiles,),
            in_specs=[pl.BlockSpec((5, L, cols), lambda i: (0, 0, 0))],
            out_specs=pl.BlockSpec((tile_rows, cols), lambda i: (i, 0)),
        ),
        compiler_params=pltpu.CompilerParams(
            dimension_semantics=("parallel",)),
    )(consts)

    if flat:
        pe = table.reshape(-1)[: seq_len * d_model].reshape(seq_len, d_model)
    else:
        pe = table[:seq_len, :]
    return pe[None, :, :]


def positional_embedding(x, d_model):
    """Returns pe[:, :x.shape[1]] with shape (1, seq_len, d_model), float32."""
    return _pe_table(int(x.shape[1]), int(d_model))


def _reference(seq_len, d_model):
    position = jnp.arange(seq_len, dtype=jnp.float32)[:, None]
    div_term = jnp.exp(jnp.arange(0, d_model, 2, dtype=jnp.float32)
                       * (-(math.log(10000.0) / d_model)))
    pe = jnp.zeros((seq_len, d_model), jnp.float32)
    pe = pe.at[:, 0::2].set(jnp.sin(position * div_term))
    pe = pe.at[:, 1::2].set(jnp.cos(position * div_term))
    return pe[None, :, :]


if __name__ == "__main__":
    key = jax.random.PRNGKey(0)
    batch, seq_len, d_model = 2, 8, 32
    x = jax.random.normal(key, (batch, seq_len, d_model), dtype=jnp.float32)

    out = jax.block_until_ready(positional_embedding(x, d_model))
    ref = _reference(seq_len, d_model)
    assert out.shape == (1, seq_len, d_model), out.shape
    assert out.dtype == jnp.float32
    assert jnp.allclose(out, ref, atol=1e-5, rtol=1e-5), "mismatch vs reference"

    # Non-multiple-of-8 seq length; flat layout with recurrence steps.
    oa = jax.block_until_ready(positional_embedding(jnp.zeros((1, 100, 32)), 32))
    assert jnp.allclose(oa, _reference(100, 32), atol=1e-4, rtol=1e-5)

    # d_model < 128 that does NOT divide 128 (periodic flat layout, L=24).
    ob = jax.block_until_ready(positional_embedding(jnp.zeros((1, 300, 48)), 48))
    assert jnp.allclose(ob, _reference(300, 48), atol=1e-4, rtol=1e-5)

    # d_model == 128 (natural layout).
    oc = jax.block_until_ready(positional_embedding(jnp.zeros((1, 24, 128)), 128))
    assert jnp.allclose(oc, _reference(24, 128), atol=1e-4, rtol=1e-5)

    # d_model that is neither <128 nor a multiple of 128 (full-extent lane dim).
    od = jax.block_until_ready(positional_embedding(jnp.zeros((1, 16, 192)), 192))
    assert jnp.allclose(od, _reference(16, 192), atol=1e-4, rtol=1e-5)

    # Longer sequence: multi-tile grid (4 parallel blocks) + mid-tile re-seed.
    # f32 argument rounding at positions ~1e3 limits agreement with the f32
    # reference to ~angle * 2^-22 on the highest-frequency lanes (the reference
    # has the same absolute uncertainty vs. the true value), hence looser atol.
    oe = jax.block_until_ready(positional_embedding(jnp.zeros((1, 1200, 64)), 64))
    assert jnp.allclose(oe, _reference(1200, 64), atol=2e-3, rtol=1e-5)

    print("KERNEL_OK")
</pallas_src>

<mosaic_0001>
module attributes {stable_mosaic.version = 11 : i64} {
  func.func @_pe_kernel(%arg0: i32, %arg1: memref<5x8x128xf32, #tpu.memory_space<vmem>>, %arg2: memref<8x128xf32, #tpu.memory_space<vmem>>) attributes {dimension_semantics = [#tpu.dimension_semantics<parallel>], iteration_bounds = array<i64: 1>, scalar_prefetch = 0 : i64, scratch_operands = 0 : i64, tpu.core_type = #tpu.core_type<tc>, window_params = [{pipeline_mode = #tpu.pipeline_mode<synchronous>, transform_indices = @transform_0, window_bounds = array<i64: 5, 8, 128>}, {transform_indices = @transform_1, window_bounds = array<i64: 8, 128>}]} {
    %c0 = arith.constant 0 : index
    %c0_0 = arith.constant 0 : index
    %c0_1 = arith.constant 0 : index
    %0 = vector.load %arg1[%c0, %c0_0, %c0_1] : memref<5x8x128xf32, #tpu.memory_space<vmem>>, vector<1x8x128xf32>
    %1 = vector.shape_cast %0 : vector<1x8x128xf32> to vector<8x128xf32>
    %c1 = arith.constant 1 : index
    %c0_2 = arith.constant 0 : index
    %c0_3 = arith.constant 0 : index
    %2 = vector.load %arg1[%c1, %c0_2, %c0_3] : memref<5x8x128xf32, #tpu.memory_space<vmem>>, vector<1x8x128xf32>
    %3 = vector.shape_cast %2 : vector<1x8x128xf32> to vector<8x128xf32>
    %c2 = arith.constant 2 : index
    %c0_4 = arith.constant 0 : index
    %c0_5 = arith.constant 0 : index
    %4 = vector.load %arg1[%c2, %c0_4, %c0_5] : memref<5x8x128xf32, #tpu.memory_space<vmem>>, vector<1x8x128xf32>
    %5 = vector.shape_cast %4 : vector<1x8x128xf32> to vector<8x128xf32>
    %cst = arith.constant 5.000000e-01 : f32
    %6 = vector.broadcast %cst : f32 to vector<8x128xf32>
    %7 = arith.cmpf ogt, %5, %6 : vector<8x128xf32>
    %c1_i32 = arith.constant 1 : i32
    %8 = arith.muli %arg0, %c1_i32 : i32
    %c0_i32 = arith.constant 0 : i32
    %9 = arith.addi %8, %c0_i32 : i32
    %10 = arith.sitofp %9 : i32 to f32
    %cst_6 = arith.constant 3.200000e+01 : f32
    %11 = arith.mulf %10, %cst_6 : f32
    %12 = vector.broadcast %11 : f32 to vector<8x128xf32>
    %13 = arith.addf %12, %3 : vector<8x128xf32>
    %14 = arith.mulf %13, %1 : vector<8x128xf32>
    %15 = math.sin %14 : vector<8x128xf32>
    %16 = math.cos %14 : vector<8x128xf32>
    %17 = arith.select %7, %16, %15 : vector<8x128xi1>, vector<8x128xf32>
    %c0_7 = arith.constant 0 : index
    %c0_8 = arith.constant 0 : index
    %18 = vector.load %arg2[%c0_7, %c0_8] : memref<8x128xf32, #tpu.memory_space<vmem>>, vector<8x128xf32>
    tpu.vector_store %arg2[%c0_7, %c0_8], %17 {strides = array<i32>} : memref<8x128xf32, #tpu.memory_space<vmem>>, vector<8x128xf32>,
    return
  }
  func.func @transform_0(%arg0: i32) -> (i32, i32, i32) {
    %c0_i32 = arith.constant 0 : i32
    %c0_i32_0 = arith.constant 0 : i32
    %c0_i32_1 = arith.constant 0 : i32
    %c0_i32_2 = arith.constant 0 : i32
    return %c0_i32, %c0_i32_0, %c0_i32_1 : i32, i32, i32
  }
  func.func @transform_1(%arg0: i32) -> (i32, i32) {
    %c0_i32 = arith.constant 0 : i32
    %c0_i32_0 = arith.constant 0 : i32
    return %arg0, %c0_i32 : i32, i32
  }
}

</mosaic_0001>

<bundles_post_ra>
// kernel: tpu_custom_call.1
= control target key start
LH: loop header
LB: loop body
LE: loop exit
PB: predicated region body
PF: predicated region fallthrough
CT: control target
= control target key end

     0   :  { %6 = vsyncpa [#allocation3], 0  ;;  %s506_s0 = inlined_call_operand.hbm [shape: f32[5,8,128], index: 0, kind: input, shape index: {}]   ;;  %s507_s1 = inlined_call_operand.hbm [shape: f32[8,128], index: 1, kind: output, shape index: {}]  }
   0x1   :  { %7 = vsyncpa [#allocation4], 0  ;;  %s12_s8 = sshll.u32 %s506_s0, 4  ;;  %s433_s9 = smov [#allocation2]   ;;  %s13_s8 = int_to_ptr.hbm [resolvable:$true] %s12_s8 }
   0x2   :  { %s14_s10 = sshll.u32 %s433_s9, 4  ;;  %s434_s11 = smov 128   ;;  %s15_s10 = int_to_ptr.vmem [resolvable:$true] %s14_s10 }
   0x3   :  { %s435_s12 = smov 8  }
   0x4   :  { %20 = dma.hbm_to_vmem [thread:$0]  %s13_s8, 640, %s15_s10, [#allocation3], %s434_s11, %s434_s11, %s435_s12  }
   0x5   :  { %429 = dma.done.wait [#allocation3], 640  }
   0x6   :  { %430 = vsyncadd [#allocation3], 4294966656  ;;  %v25_v0 = vld [vmem:[#allocation2] sm:$0xff]  ;;  %v27_v1 = vld [vmem:[#allocation2 + $0x8] sm:$0xff]  ;;  %v436_v14 = vmov 683565275  }
   0x7   :  { %v457_v2 = vmul.f32 %v27_v1, %v25_v0  ;;  %v437_v16 = vmov 2475754826   ;;  %v438_v18 = vmov 2131351028   ;;  %v439_v20 = vmov 2102212464  }
   0x8   :  { %v440_v22 = vmov 920167782   ;;  %v441_v28 = vmov 1326507024   ;;  %s443_s0 = smov [#allocation5]   ;;  %s354_s16 = sshll.u32 %s507_s1, 4  ;;  %s355_s16 = int_to_ptr.hbm [resolvable:$true] %s354_s16 }
   0x9   :  { %v39_v3 = vand.u32 2139095040, %v457_v2  ;;  %v36_v5 = vand.u32 2147483647, %v457_v2  ;;  %vm38_vm12 = vcmp.lt.s32.totalorder %v457_v2, 0  ;;  %s352_s13 = sshll.u32 %s443_s0, 4  ;;  %s353_s13 = int_to_ptr.vmem [resolvable:$true] %s352_s13 }
   0xb   :  { %v40_v4 = vshrl.u32 %v39_v3, 23  ;;  %v43_v8 = vand.u32 8388607, %v36_v5  ;;  %v442_v3 = vmov 0   ;;  %vm37_vm13 = vcmp.le.f32.partialorder %v36_v5, 0.7853982 }
   0xd   :  { %v364_v6 = vadd.s32 4294967169, %v40_v4  ;;  %v44_v11 = vor.u32 8388608, %v43_v8 }
   0xf   :  { %v46_v7 = vadd.s32 1, %v364_v6  ;;  %v466_v30 = vshll.u32 %v44_v11, 8 }
  0x11   :  { %vm47_vm0 = vcmp.gt.s32.totalorder %v46_v7, 0  ;;  %v85_v42 = vand.u32 65535, %v466_v30  ;;  %v86_v43 = vshrl.u32 %v466_v30, 16 }
  0x12   :  { %v48_v9 = vsel %vm47_vm0, %v46_v7, 0 }
  0x13   :  { %v50_v10 = vand.u32 31, %v48_v9  ;;  %v463_v12 = vshrl.u32 %v48_v9, 5 }
  0x15   :  { %v51_v13 = vsub.s32 32, %v50_v10  ;;  %v53_v15 = vshll.u32 %v436_v14, %v50_v10  ;;  %v56_v17 = vshll.u32 %v437_v16, %v50_v10  ;;  %v59_v19 = vshll.u32 %v438_v18, %v50_v10 }
  0x16   :  { %v62_v21 = vshll.u32 %v439_v20, %v50_v10  ;;  %v65_v23 = vshll.u32 %v440_v22, %v50_v10  ;;  %vm68_vm1 = vcmp.lt.s32.totalorder %v463_v12, 1  ;;  %vm71_vm2 = vcmp.lt.s32.totalorder %v463_v12, 4 }
  0x17   :  { %v54_v24 = vshrl.u32 %v437_v16, %v51_v13  ;;  %v57_v25 = vshrl.u32 %v438_v18, %v51_v13  ;;  %v60_v26 = vshrl.u32 %v439_v20, %v51_v13  ;;  %v63_v27 = vshrl.u32 %v440_v22, %v51_v13 }
  0x18   :  { %v66_v29 = vshrl.u32 %v441_v28, %v51_v13  ;;  %vm70_vm3 = vcmp.lt.s32.totalorder %v463_v12, 3  ;;  %vm69_vm4 = vcmp.lt.s32.totalorder %v463_v12, 2  ;;  %v52_v50 = vshrl.u32 %v436_v14, %v51_v13 }
  0x19   :  { %v55_v31 = vor.u32 %v54_v24, %v53_v15  ;;  %v58_v32 = vor.u32 %v57_v25, %v56_v17  ;;  %v61_v33 = vor.u32 %v60_v26, %v59_v19  ;;  %v64_v34 = vor.u32 %v63_v27, %v62_v21 }
  0x1a   :  { %v67_v35 = vor.u32 %v66_v29, %v65_v23 }
  0x1b   :  { %v76_v36 = vsel %vm68_vm1, %v55_v31, %v58_v32  ;;  %v80_v37 = vsel %vm68_vm1, %v58_v32, %v61_v33  ;;  %v77_v38 = vsel %vm71_vm2, %v64_v34, 920167782  ;;  %v72_v63 = vsel %vm68_vm1, %v52_v50, %v55_v31 }
  0x1c   :  { %v81_v39 = vsel %vm71_vm2, %v67_v35, 1326507024  ;;  %v78_v40 = vsel %vm70_vm3, %v61_v33, %v77_v38  ;;  %v73_v1 = vsel %vm71_vm2, %v61_v33, 2102212464 }
  0x1d   :  { %v82_v41 = vsel %vm70_vm3, %v64_v34, %v81_v39  ;;  %v79_v44 = vsel %vm69_vm4, %v76_v36, %v78_v40  ;;  %v74_v14 = vsel %vm70_vm3, %v58_v32, %v73_v1 }
  0x1e   :  { %v83_v45 = vsel %vm69_vm4, %v80_v37, %v82_v41  ;;  %v109_v48 = vand.u32 65535, %v79_v44  ;;  %v110_v49 = vshrl.u32 %v79_v44, 16  ;;  %v75_v22 = vsel %vm69_vm4, %v72_v63, %v74_v14 }
  0x1f   :  { %v87_v46 = vand.u32 65535, %v83_v45  ;;  %v88_v47 = vshrl.u32 %v83_v45, 16  ;;  %v129_v26 = vmul.u32 %v466_v30, %v75_v22  ;;  %vm179_vm4 = vweird.f32 %v457_v2 }
  0x20   :  { %v111_v54 = vmul.u32 %v109_v48, %v85_v42  ;;  %v112_v55 = vmul.u32 %v110_v49, %v85_v42  ;;  %v113_v56 = vmul.u32 %v109_v48, %v86_v43  ;;  %v114_v60 = vmul.u32 %v110_v49, %v86_v43 }
  0x21   :  { %v89_v51 = vmul.u32 %v87_v46, %v85_v42  ;;  %v90_v52 = vmul.u32 %v88_v47, %v85_v42  ;;  %v91_v53 = vmul.u32 %v87_v46, %v86_v43  ;;  %v92_v57 = vmul.u32 %v88_v47, %v86_v43 }
  0x22   :  { %v115_v61 = vshll.u32 %v112_v55, 16  ;;  %v117_v62 = vshll.u32 %v113_v56, 16  ;;  %v116_v11 = vshrl.u32 %v112_v55, 16  ;;  %v118_v18 = vshrl.u32 %v113_v56, 16 }
  0x23   :  { %v93_v58 = vshll.u32 %v90_v52, 16  ;;  %v95_v59 = vshll.u32 %v91_v53, 16  ;;  %v94_v7 = vshrl.u32 %v90_v52, 16  ;;  %v96_v15 = vshrl.u32 %v91_v53, 16 }
  0x24   :  { %vm119_vm6 = vc.u32 %v111_v54, %v115_v61  ;;  %v121_v6 = vadd.s32 %v115_v61, %v111_v54 }
  0x25   :  { %vm97_vm5 = vc.u32 %v89_v51, %v93_v58  ;;  %v99_v0 = vadd.s32 %v93_v58, %v89_v51  ;;  %v120_v9 = vsel %vm119_vm6, 1, %v442_v3 }
  0x26   :  { %v98_v4 = vsel %vm97_vm5, 1, %v442_v3  ;;  %v122_v13 = vadd.s32 %v120_v9, %v114_v60  ;;  %vm123_vm8 = vc.u32 %v121_v6, %v117_v62  ;;  %v125_v21 = vadd.s32 %v121_v6, %v117_v62 }
  0x27   :  { %v100_v8 = vadd.s32 %v98_v4, %v92_v57  ;;  %vm101_vm7 = vc.u32 %v99_v0, %v95_v59  ;;  %v124_v17 = vsel %vm123_vm8, 1, %v442_v3 }
  0x28   :  { %v102_v10 = vsel %vm101_vm7, 1, %v442_v3  ;;  %v126_v19 = vadd.s32 %v124_v17, %v122_v13 }
  0x29   :  { %v104_v16 = vadd.s32 %v102_v10, %v100_v8 }
  0x2a   :  { %v127_v23 = vadd.s32 %v126_v19, %v116_v11  ;;  %v29_v11 = vld [vmem:[#allocation2 + $0x10] sm:$0xff] }
  0x2b   :  { %v105_v20 = vadd.s32 %v104_v16, %v94_v7  ;;  %vm30_vm5 = vcmp.gt.f32.partialorder %v29_v11, 0.5 }
  0x2c   :  { %v128_v25 = vadd.s32 %v127_v23, %v118_v18 }
  0x2d   :  { %v106_v24 = vadd.s32 %v105_v20, %v96_v15 }
  0x2e   :  { %v132_v27 = vadd.s32 1, %v128_v25 }
  0x2f   :  { %vm131_vm9 = vc.u32 %v106_v24, %v125_v21  ;;  %v130_v12 = vadd.s32 %v125_v21, %v106_v24 }
  0x30   :  { %v133_v28 = vsel %vm131_vm9, %v132_v27, %v128_v25 }
  0x31   :  { %v134_v29 = vadd.s32 %v133_v28, %v129_v26 }
  0x33   :  { %v135_v31 = vadd.s32 536870912, %v134_v29 }
  0x35   :  { %v136_v32 = vshrl.u32 %v135_v31, 30 }
  0x37   :  { %v137_v33 = vshll.u32 %v136_v32, 30  ;;  %v160_v50 = vsub.s32 4, %v136_v32 }
  0x39   :  { %v138_v34 = vsub.s32 %v134_v29, %v137_v33  ;;  %v161_v53 = vsel %vm38_vm12, %v160_v50, %v136_v32 }
  0x3a   :  { %v163_v56 = vsel %vm37_vm13, 0, %v161_v53 }
  0x3b   :  { %vm139_vm10 = vcmp.lt.s32.totalorder %v138_v34, 0  ;;  %v140_v35 = vsub.s32 0, %v138_v34  ;;  %v180_v61 = vadd.s32 3, %v163_v56  ;;  %v335_v4 = vand.u32 3, %v163_v56 }
  0x3d   :  { %v141_v36 = vsel %vm139_vm10, %v140_v35, %v138_v34  ;;  %v181_v3 = vand.u32 3, %v180_v61  ;;  %vm340_vm15 = vcmp.eq.s32.totalorder %v335_v4, 2  ;;  %vm337_vm2 = vcmp.eq.s32.totalorder %v335_v4, 0 }
  0x3e   :  { %v142_v37 = vclz %v141_v36  ;;  %vm336_vm3 = vcmp.lt.s32.totalorder %v335_v4, 2 }
  0x3f   :  { %vm186_vm14 = vcmp.eq.s32.totalorder %v181_v3, 2  ;;  %vm182_vm0 = vcmp.lt.s32.totalorder %v181_v3, 2  ;;  %vm183_vm1 = vcmp.eq.s32.totalorder %v181_v3, 0 }
  0x40   :  { %v365_v38 = vadd.s32 4294967294, %v142_v37 }
  0x42   :  { %vm366_vm11 = vcmp.lt.s32.totalorder %v365_v38, 0 }
  0x43   :  { %v145_v39 = vsel %vm366_vm11, 0, %v365_v38 }
  0x44   :  { %v146_v40 = vsub.s32 32, %v145_v39  ;;  %v147_v41 = vshll.u32 %v138_v34, %v145_v39  ;;  %v150_v42 = vsub.s32 4294967266, %v145_v39 }
  0x46   :  { %v148_v30 = vshrl.u32 %v130_v12, %v146_v40  ;;  %v151_v43 = vadd.s32 127, %v150_v42 }
  0x48   :  { %v149_v44 = vor.u32 %v148_v30, %v147_v41  ;;  %v152_v45 = vshll.u32 %v151_v43, 23 }
  0x4a   :  { %v153_v46 = vor.u32 4788187, %v152_v45  ;;  %v156_v47 = vcvt.s32.f32 %v149_v44 }
  0x4c   :  { %v154_v48 = vand.u32 2147483647, %v153_v46 }
  0x4e   :  { %v157_v49 = vmul.f32 %v156_v47, %v154_v48 }
  0x50   :  { %v158_v51 = vxor.u32 2147483648, %v157_v49 }
  0x52   :  { %v159_v52 = vsel %vm38_vm12, %v158_v51, %v157_v49 }
  0x53   :  { %v162_v54 = vsel %vm37_vm13, %v457_v2, %v159_v52 }
  0x54   :  { %v164_v55 = vmul.f32 %v162_v54, %v162_v54 }
  0x56   :  { %v165_v57 = vmul.f32 -0.001358992, %v164_v55  ;;  %v172_v58 = vmul.f32 -0.00019511016, %v164_v55 }
  0x58   :  { %v166_v59 = vadd.f32 0.041655596, %v165_v57  ;;  %v173_v60 = vadd.f32 0.008332121, %v172_v58 }
  0x5a   :  { %v167_v62 = vmul.f32 %v166_v59, %v164_v55  ;;  %v174_v63 = vmul.f32 %v173_v60, %v164_v55 }
  0x5c   :  { %v168_v0 = vadd.f32 -0.4999988, %v167_v62  ;;  %v175_v1 = vadd.f32 -0.16666654, %v174_v63 }
  0x5e   :  { %v169_v6 = vmul.f32 %v168_v0, %v164_v55  ;;  %v176_v5 = vmul.f32 %v175_v1, %v164_v55 }
  0x60   :  { %v170_v7 = vadd.f32 1.0, %v169_v6  ;;  %v177_v8 = vadd.f32 1.0, %v176_v5 }
  0x62   :  { %v178_v9 = vmul.f32 %v177_v8, %v162_v54  ;;  %v187_v10 = vxor.u32 2147483648, %v170_v7 }
  0x64   :  { %v184_v13 = vxor.u32 2147483648, %v178_v9  ;;  %v188_v14 = vsel %vm186_vm14, %v187_v10, %v178_v9  ;;  %v342_v15 = vsel %vm340_vm15, %v187_v10, %v178_v9 }
  0x66   :  { %v185_v16 = vsel %vm183_vm1, %v170_v7, %v184_v13  ;;  %v339_v17 = vsel %vm337_vm2, %v170_v7, %v184_v13 }
  0x67   :  { %v189_v18 = vsel %vm182_vm0, %v185_v16, %v188_v14  ;;  %v343_v19 = vsel %vm336_vm3, %v339_v17, %v342_v15 }
  0x68   :  { %v190_v20 = vsel %vm179_vm4, nan, %v189_v18  ;;  %v344_v21 = vsel %vm179_vm4, nan, %v343_v19 }
  0x69   :  { %v345_v22 = vsel %vm30_vm5, %v344_v21, %v190_v20 }
  0x6a   :  { %346 = vst [vmem:[#allocation5] sm:$0xff] %v345_v22 }
  0x6b   :  { %357 = dma.vmem_to_hbm [thread:$0]  %s353_s13, 128, %s355_s16, [#allocation4]  }
  0x6c   :  { %431 = dma.done.wait [#allocation4], 128  }
  0x6d   :  { %432 = vsyncadd [#allocation4], 4294967168 }
  0x6e   :  { %362 = vsyncpa [#allocation3], 1 }
  0x6f   :  { %363 = vsyncpa [#allocation4], 1 }

</bundles_post_ra>
